<compile_context>
chip_gen: v6e
topology: v6e:2x2x1
jax: 0.10.0
libtpu: 0.0.40
codegen_flags: <defaults>
</compile_context>

<pallas_src>
import functools
import math

import jax
import jax.numpy as jnp
from jax.experimental import pallas as pl
from jax.experimental.pallas import tpu as pltpu


def _eda_kernel(x_ref, enc_ref, wq_ref, bq_ref, wk_ref, bk_ref, wv_ref, bv_ref,
                o_ref, *, inv_sqrt_dk):
    Bb, Sq, D = x_ref.shape
    _, Sk, _ = enc_ref.shape
    cdt = x_ref.dtype  # matmul operand dtype (bf16)

    # Projections as single tall matmuls: (Bb*S, D) @ (D, D), f32 accumulate,
    # bias added in f32.
    x2 = x_ref[...].reshape(Bb * Sq, D)
    e2 = enc_ref[...].reshape(Bb * Sk, D)
    q2 = jnp.dot(x2, wq_ref[...], preferred_element_type=jnp.float32) + bq_ref[...]
    k2 = jnp.dot(e2, wk_ref[...], preferred_element_type=jnp.float32) + bk_ref[...]
    v2 = jnp.dot(e2, wv_ref[...], preferred_element_type=jnp.float32) + bv_ref[...]

    # Fold 1/sqrt(dk) into q (Sq*D elements — cheaper than scaling Sq*Sk scores).
    q = (q2 * inv_sqrt_dk).astype(cdt).reshape(Bb, Sq, D)
    k = k2.astype(cdt).reshape(Bb, Sk, D)
    v = v2.astype(cdt).reshape(Bb, Sk, D)

    # Scores: contract the last dims of q and k directly (no explicit transpose).
    s = jax.lax.dot_general(
        q, k, dimension_numbers=(((2,), (2,)), ((0,), (0,))),
        preferred_element_type=jnp.float32)                     # (Bb, Sq, Sk)

    # Softmax kept entirely in f32; denominator reciprocal on the EUP (approx).
    s = s - jnp.max(s, axis=-1, keepdims=True)
    p = jnp.exp(s)
    p = p * pl.reciprocal(jnp.sum(p, axis=-1, keepdims=True), approx=True)

    z = jax.lax.dot_general(
        p.astype(cdt), v, dimension_numbers=(((2,), (1,)), ((0,), (0,))),
        preferred_element_type=jnp.float32)                     # (Bb, Sq, D)

    o_ref[...] = z.astype(o_ref.dtype)


def _pick_block_b(B, Sq, Sk, D, itemsize):
    """Largest batch block that divides B, keeps the per-step activation
    footprint modest, and prefers >=256 projection rows per step (fills the
    256-wide MXU on v6e/v7x)."""
    budget = 8 * 1024 * 1024
    best = 1
    for cand in range(1, B + 1):
        if B % cand:
            continue
        act_bytes = cand * ((Sq + Sk) * D * itemsize        # x, enc tiles
                            + 3 * max(Sq, Sk) * D * 4        # q, k, v (f32)
                            + Sq * Sk * 4                    # scores
                            + Sq * D * 4)                    # output
        if act_bytes > budget:
            break
        best = cand
        if cand * Sq >= 256:
            break
    return best


def encoder_decoder_attention(x, encoded, wq, bq, wk, bk, wv, bv, *,
                              block_b=None, compute_dtype=jnp.bfloat16):
    """x: [B, Sq, D], encoded: [B, Sk, D]; wq/wk/wv are nn.Linear weights
    [D_out, D_in]; bq/bk/bv are [D_out]. Returns [B, Sq, D] in x.dtype."""
    B, Sq, D = x.shape
    _, Sk, _ = encoded.shape
    inv_sqrt_dk = 1.0 / math.sqrt(D)

    if block_b is None:
        block_b = _pick_block_b(B, Sq, Sk, D, jnp.dtype(compute_dtype).itemsize)
    assert B % block_b == 0

    # Glue (outside the kernel): cast matmul operands to bf16, pre-transpose the
    # nn.Linear weights to [D_in, D_out] so the kernel computes x @ W + b, and
    # keep biases as (1, D) f32 so the bias add happens in the f32 accumulator.
    x_c = x.astype(compute_dtype)
    e_c = encoded.astype(compute_dtype)
    wq_t = wq.T.astype(compute_dtype)
    wk_t = wk.T.astype(compute_dtype)
    wv_t = wv.T.astype(compute_dtype)
    bq2 = bq.reshape(1, D).astype(jnp.float32)
    bk2 = bk.reshape(1, D).astype(jnp.float32)
    bv2 = bv.reshape(1, D).astype(jnp.float32)

    kernel = functools.partial(_eda_kernel, inv_sqrt_dk=inv_sqrt_dk)

    x_spec = pl.BlockSpec((block_b, Sq, D), lambda b: (b, 0, 0))
    e_spec = pl.BlockSpec((block_b, Sk, D), lambda b: (b, 0, 0))
    # Constant index maps -> weights/biases are fetched once and stay resident.
    # TODO(synk): for large D (>=2048, esp. v7x's 64 MiB VMEM) single-buffer the
    # weights (pipeline_mode=pl.Buffered(1)) and/or tile projections over D_out.
    w_spec = pl.BlockSpec((D, D), lambda b: (0, 0))
    b_spec = pl.BlockSpec((1, D), lambda b: (0, 0))
    o_spec = pl.BlockSpec((block_b, Sq, D), lambda b: (b, 0, 0))

    # TODO(synk): for long encoder sequences (Sk >~ 1k), add an Sk grid axis with
    # an online-softmax (flash-style) accumulator instead of the full (Sq, Sk) tile.
    return pl.pallas_call(
        kernel,
        out_shape=jax.ShapeDtypeStruct((B, Sq, D), x.dtype),
        grid_spec=pltpu.PrefetchScalarGridSpec(
            num_scalar_prefetch=0,
            grid=(B // block_b,),
            in_specs=[x_spec, e_spec,
                      w_spec, b_spec, w_spec, b_spec, w_spec, b_spec],
            out_specs=o_spec,
        ),
        compiler_params=pltpu.CompilerParams(
            dimension_semantics=("parallel",),
            vmem_limit_bytes=32 * 1024 * 1024,
        ),
    )(x_c, e_c, wq_t, bq2, wk_t, bk2, wv_t, bv2)


def _reference(x, encoded, wq, bq, wk, bk, wv, bv):
    q = x @ wq.T + bq
    k = encoded @ wk.T + bk
    v = encoded @ wv.T + bv
    s = jnp.einsum("bqd,bkd->bqk", q, k) / math.sqrt(x.shape[-1])
    p = jax.nn.softmax(s, axis=-1)
    return jnp.einsum("bqk,bkd->bqd", p, v)


if __name__ == "__main__":
    # Small but lane-aligned shapes (D = 128 keeps output stores lane-dense).
    B, Sq, Sk, D = 2, 8, 8, 128

    key = jax.random.PRNGKey(0)
    kx, ke, k1, k2, k3, k4, k5, k6 = jax.random.split(key, 8)

    x = jax.random.normal(kx, (B, Sq, D), dtype=jnp.float32)
    encoded = jax.random.normal(ke, (B, Sk, D), dtype=jnp.float32)

    # Deterministic nn.Linear-style params: weight [D_out, D_in], bias [D_out].
    bound = 1.0 / math.sqrt(D)
    wq = jax.random.uniform(k1, (D, D), minval=-bound, maxval=bound, dtype=jnp.float32)
    bq = jax.random.uniform(k2, (D,), minval=-bound, maxval=bound, dtype=jnp.float32)
    wk = jax.random.uniform(k3, (D, D), minval=-bound, maxval=bound, dtype=jnp.float32)
    bk = jax.random.uniform(k4, (D,), minval=-bound, maxval=bound, dtype=jnp.float32)
    wv = jax.random.uniform(k5, (D, D), minval=-bound, maxval=bound, dtype=jnp.float32)
    bv = jax.random.uniform(k6, (D,), minval=-bound, maxval=bound, dtype=jnp.float32)

    z = encoder_decoder_attention(x, encoded, wq, bq, wk, bk, wv, bv)
    jax.block_until_ready(z)

    z_ref = _reference(x, encoded, wq, bq, wk, bk, wv, bv)
    assert z.shape == (B, Sq, D)
    assert z.dtype == x.dtype
    # bf16 matmul operands + approx reciprocal -> widened tolerance vs f32 ref.
    assert jnp.allclose(z, z_ref, rtol=2e-2, atol=2e-2), float(
        jnp.max(jnp.abs(z - z_ref)))

    print("KERNEL_OK")
</pallas_src>

<mosaic_0001>
module attributes {stable_mosaic.version = 11 : i64} {
  func.func @_eda_kernel(%arg0: i32, %arg1: memref<2x8x128xbf16, #tpu.memory_space<vmem>>, %arg2: memref<2x8x128xbf16, #tpu.memory_space<vmem>>, %arg3: memref<128x128xbf16, #tpu.memory_space<vmem>>, %arg4: memref<1x128xf32, #tpu.memory_space<vmem>>, %arg5: memref<128x128xbf16, #tpu.memory_space<vmem>>, %arg6: memref<1x128xf32, #tpu.memory_space<vmem>>, %arg7: memref<128x128xbf16, #tpu.memory_space<vmem>>, %arg8: memref<1x128xf32, #tpu.memory_space<vmem>>, %arg9: memref<2x8x128xf32, #tpu.memory_space<vmem>>) attributes {dimension_semantics = [#tpu.dimension_semantics<parallel>], iteration_bounds = array<i64: 1>, scalar_prefetch = 0 : i64, scratch_operands = 0 : i64, tpu.core_type = #tpu.core_type<tc>, window_params = [{transform_indices = @transform_0, window_bounds = array<i64: 2, 8, 128>}, {transform_indices = @transform_1, window_bounds = array<i64: 2, 8, 128>}, {pipeline_mode = #tpu.pipeline_mode<synchronous>, transform_indices = @transform_2, window_bounds = array<i64: 128, 128>}, {pipeline_mode = #tpu.pipeline_mode<synchronous>, transform_indices = @transform_3, window_bounds = array<i64: 1, 128>}, {pipeline_mode = #tpu.pipeline_mode<synchronous>, transform_indices = @transform_4, window_bounds = array<i64: 128, 128>}, {pipeline_mode = #tpu.pipeline_mode<synchronous>, transform_indices = @transform_5, window_bounds = array<i64: 1, 128>}, {pipeline_mode = #tpu.pipeline_mode<synchronous>, transform_indices = @transform_6, window_bounds = array<i64: 128, 128>}, {pipeline_mode = #tpu.pipeline_mode<synchronous>, transform_indices = @transform_7, window_bounds = array<i64: 1, 128>}, {transform_indices = @transform_8, window_bounds = array<i64: 2, 8, 128>}]} {
    %c0 = arith.constant 0 : index
    %c0_0 = arith.constant 0 : index
    %c0_1 = arith.constant 0 : index
    %0 = vector.load %arg1[%c0, %c0_0, %c0_1] : memref<2x8x128xbf16, #tpu.memory_space<vmem>>, vector<2x8x128xbf16>
    %1 = vector.shape_cast %0 : vector<2x8x128xbf16> to vector<16x128xbf16>
    %c0_2 = arith.constant 0 : index
    %c0_3 = arith.constant 0 : index
    %c0_4 = arith.constant 0 : index
    %2 = vector.load %arg2[%c0_2, %c0_3, %c0_4] : memref<2x8x128xbf16, #tpu.memory_space<vmem>>, vector<2x8x128xbf16>
    %3 = vector.shape_cast %2 : vector<2x8x128xbf16> to vector<16x128xbf16>
    %c0_5 = arith.constant 0 : index
    %c0_6 = arith.constant 0 : index
    %4 = vector.load %arg3[%c0_5, %c0_6] : memref<128x128xbf16, #tpu.memory_space<vmem>>, vector<128x128xbf16>
    %cst = arith.constant dense<0.000000e+00> : vector<16x128xf32>
    %5 = tpu.matmul %1, %4, %cst {dimension_numbers = #tpu.dot_dimension_numbers<[1], [0], [0], [1], [0, 0, 1, 1], [], []>} : vector<16x128xbf16>, vector<128x128xbf16>, vector<16x128xf32> -> vector<16x128xf32>
    %c0_7 = arith.constant 0 : index
    %c0_8 = arith.constant 0 : index
    %6 = vector.load %arg4[%c0_7, %c0_8] : memref<1x128xf32, #tpu.memory_space<vmem>>, vector<1x128xf32>
    %7 = vector.broadcast %6 : vector<1x128xf32> to vector<16x128xf32>
    %8 = arith.addf %5, %7 : vector<16x128xf32>
    %c0_9 = arith.constant 0 : index
    %c0_10 = arith.constant 0 : index
    %9 = vector.load %arg5[%c0_9, %c0_10] : memref<128x128xbf16, #tpu.memory_space<vmem>>, vector<128x128xbf16>
    %cst_11 = arith.constant dense<0.000000e+00> : vector<16x128xf32>
    %10 = tpu.matmul %3, %9, %cst_11 {dimension_numbers = #tpu.dot_dimension_numbers<[1], [0], [0], [1], [0, 0, 1, 1], [], []>} : vector<16x128xbf16>, vector<128x128xbf16>, vector<16x128xf32> -> vector<16x128xf32>
    %c0_12 = arith.constant 0 : index
    %c0_13 = arith.constant 0 : index
    %11 = vector.load %arg6[%c0_12, %c0_13] : memref<1x128xf32, #tpu.memory_space<vmem>>, vector<1x128xf32>
    %12 = vector.broadcast %11 : vector<1x128xf32> to vector<16x128xf32>
    %13 = arith.addf %10, %12 : vector<16x128xf32>
    %c0_14 = arith.constant 0 : index
    %c0_15 = arith.constant 0 : index
    %14 = vector.load %arg7[%c0_14, %c0_15] : memref<128x128xbf16, #tpu.memory_space<vmem>>, vector<128x128xbf16>
    %cst_16 = arith.constant dense<0.000000e+00> : vector<16x128xf32>
    %15 = tpu.matmul %3, %14, %cst_16 {dimension_numbers = #tpu.dot_dimension_numbers<[1], [0], [0], [1], [0, 0, 1, 1], [], []>} : vector<16x128xbf16>, vector<128x128xbf16>, vector<16x128xf32> -> vector<16x128xf32>
    %c0_17 = arith.constant 0 : index
    %c0_18 = arith.constant 0 : index
    %16 = vector.load %arg8[%c0_17, %c0_18] : memref<1x128xf32, #tpu.memory_space<vmem>>, vector<1x128xf32>
    %17 = vector.broadcast %16 : vector<1x128xf32> to vector<16x128xf32>
    %18 = arith.addf %15, %17 : vector<16x128xf32>
    %cst_19 = arith.constant 0.0883883461 : f32
    %19 = vector.broadcast %cst_19 : f32 to vector<16x128xf32>
    %20 = arith.mulf %8, %19 : vector<16x128xf32>
    %21 = arith.truncf %20 : vector<16x128xf32> to vector<16x128xbf16>
    %22 = vector.shape_cast %21 : vector<16x128xbf16> to vector<2x8x128xbf16>
    %23 = arith.truncf %13 : vector<16x128xf32> to vector<16x128xbf16>
    %24 = vector.shape_cast %23 : vector<16x128xbf16> to vector<2x8x128xbf16>
    %25 = arith.truncf %18 : vector<16x128xf32> to vector<16x128xbf16>
    %26 = vector.shape_cast %25 : vector<16x128xbf16> to vector<2x8x128xbf16>
    %cst_20 = arith.constant dense<0.000000e+00> : vector<2x8x8xf32>
    %27 = tpu.matmul %22, %24, %cst_20 {dimension_numbers = #tpu.dot_dimension_numbers<[2], [2], [1], [1], [0, 0, 0, 1, 1, 1], [0], [0]>} : vector<2x8x128xbf16>, vector<2x8x128xbf16>, vector<2x8x8xf32> -> vector<2x8x8xf32>
    %cst_21 = arith.constant dense<0xFF800000> : vector<2x8xf32>
    %28 = vector.multi_reduction <maximumf>, %27, %cst_21 [2] : vector<2x8x8xf32> to vector<2x8xf32>
    %29 = vector.shape_cast %28 : vector<2x8xf32> to vector<2x8x1xf32>
    %30 = vector.broadcast %29 : vector<2x8x1xf32> to vector<2x8x8xf32>
    %31 = arith.subf %27, %30 : vector<2x8x8xf32>
    %32 = math.exp %31 : vector<2x8x8xf32>
    %cst_22 = arith.constant dense<0.000000e+00> : vector<2x8xf32>
    %33 = vector.multi_reduction <add>, %32, %cst_22 [2] : vector<2x8x8xf32> to vector<2x8xf32>
    %34 = vector.shape_cast %33 : vector<2x8xf32> to vector<2x8x1xf32>
    %35 = tpu.reciprocal %34 {approx = true} : vector<2x8x1xf32> -> vector<2x8x1xf32>
    %36 = vector.broadcast %35 : vector<2x8x1xf32> to vector<2x8x8xf32>
    %37 = arith.mulf %32, %36 : vector<2x8x8xf32>
    %38 = arith.truncf %37 : vector<2x8x8xf32> to vector<2x8x8xbf16>
    %cst_23 = arith.constant dense<0.000000e+00> : vector<2x8x128xf32>
    %39 = tpu.matmul %38, %26, %cst_23 {dimension_numbers = #tpu.dot_dimension_numbers<[2], [1], [1], [2], [0, 0, 0, 1, 1, 2], [0], [0]>} : vector<2x8x8xbf16>, vector<2x8x128xbf16>, vector<2x8x128xf32> -> vector<2x8x128xf32>
    %c0_24 = arith.constant 0 : index
    %c0_25 = arith.constant 0 : index
    %c0_26 = arith.constant 0 : index
    %40 = vector.load %arg9[%c0_24, %c0_25, %c0_26] : memref<2x8x128xf32, #tpu.memory_space<vmem>>, vector<2x8x128xf32>
    tpu.vector_store %arg9[%c0_24, %c0_25, %c0_26], %39 {strides = array<i32>} : memref<2x8x128xf32, #tpu.memory_space<vmem>>, vector<2x8x128xf32>,
    return
  }
  func.func @transform_0(%arg0: i32) -> (i32, i32, i32) {
    %c0_i32 = arith.constant 0 : i32
    %c0_i32_0 = arith.constant 0 : i32
    %c0_i32_1 = arith.constant 0 : i32
    return %arg0, %c0_i32, %c0_i32_0 : i32, i32, i32
  }
  func.func @transform_1(%arg0: i32) -> (i32, i32, i32) {
    %c0_i32 = arith.constant 0 : i32
    %c0_i32_0 = arith.constant 0 : i32
    %c0_i32_1 = arith.constant 0 : i32
    return %arg0, %c0_i32, %c0_i32_0 : i32, i32, i32
  }
  func.func @transform_2(%arg0: i32) -> (i32, i32) {
    %c0_i32 = arith.constant 0 : i32
    %c0_i32_0 = arith.constant 0 : i32
    %c0_i32_1 = arith.constant 0 : i32
    return %c0_i32, %c0_i32_0 : i32, i32
  }
  func.func @transform_3(%arg0: i32) -> (i32, i32) {
    %c0_i32 = arith.constant 0 : i32
    %c0_i32_0 = arith.constant 0 : i32
    %c0_i32_1 = arith.constant 0 : i32
    return %c0_i32, %c0_i32_0 : i32, i32
  }
  func.func @transform_4(%arg0: i32) -> (i32, i32) {
    %c0_i32 = arith.constant 0 : i32
    %c0_i32_0 = arith.constant 0 : i32
    %c0_i32_1 = arith.constant 0 : i32
    return %c0_i32, %c0_i32_0 : i32, i32
  }
  func.func @transform_5(%arg0: i32) -> (i32, i32) {
    %c0_i32 = arith.constant 0 : i32
    %c0_i32_0 = arith.constant 0 : i32
    %c0_i32_1 = arith.constant 0 : i32
    return %c0_i32, %c0_i32_0 : i32, i32
  }
  func.func @transform_6(%arg0: i32) -> (i32, i32) {
    %c0_i32 = arith.constant 0 : i32
    %c0_i32_0 = arith.constant 0 : i32
    %c0_i32_1 = arith.constant 0 : i32
    return %c0_i32, %c0_i32_0 : i32, i32
  }
  func.func @transform_7(%arg0: i32) -> (i32, i32) {
    %c0_i32 = arith.constant 0 : i32
    %c0_i32_0 = arith.constant 0 : i32
    %c0_i32_1 = arith.constant 0 : i32
    return %c0_i32, %c0_i32_0 : i32, i32
  }
  func.func @transform_8(%arg0: i32) -> (i32, i32, i32) {
    %c0_i32 = arith.constant 0 : i32
    %c0_i32_0 = arith.constant 0 : i32
    %c0_i32_1 = arith.constant 0 : i32
    return %arg0, %c0_i32, %c0_i32_0 : i32, i32, i32
  }
}

</mosaic_0001>

<bundles_post_ra>
// kernel: tpu_custom_call.1
= control target key start
LH: loop header
LB: loop body
LE: loop exit
PB: predicated region body
PF: predicated region fallthrough
CT: control target
= control target key end

     0   :  { %13 = vsyncpa [#allocation3], 0  ;;  %s1177_s0 = inlined_call_operand.hbm [shape: bf16[2,8,128], index: 0, kind: input, shape index: {}]   ;;  %s1178_s1 = inlined_call_operand.hbm [shape: bf16[2,8,128], index: 1, kind: input, shape index: {}]   ;;  %s1179_s2 = inlined_call_operand.hbm [shape: bf16[128,128], index: 2, kind: input, shape index: {}]   ;;  %s1180_s3 = inlined_call_operand.vmem [shape: f32[1,128], index: 3, kind: input, shape index: {}]   ;;  %s1181_s4 = inlined_call_operand.hbm [shape: bf16[128,128], index: 4, kind: input, shape index: {}]   ;;  %s1182_s5 = inlined_call_operand.vmem [shape: f32[1,128], index: 5, kind: input, shape index: {}]   ;;  %s1183_s6 = inlined_call_operand.hbm [shape: bf16[128,128], index: 6, kind: input, shape index: {}]   ;;  %s1184_s7 = inlined_call_operand.vmem [shape: f32[1,128], index: 7, kind: input, shape index: {}]   ;;  %s1185_s8 = inlined_call_operand.hbm [shape: f32[2,8,128], index: 8, kind: output, shape index: {}]  }
   0x1   :  { %14 = vsyncpa [#allocation6], 0 }
   0x2   :  { %15 = vsyncpa [#allocation9], 0 }
   0x3   :  { %16 = vsyncpa [#allocation4], 0  ;;  %s1030_s27 = smov [#allocation5]   ;;  %s1031_s29 = smov [#allocation8]  }
   0x4   :  { %s34_s28 = sshll.u32 %s1030_s27, 4  ;;  %s60_s30 = sshll.u32 %s1031_s29, 4  ;;  %s35_s28 = int_to_ptr.vmem [resolvable:$true] %s34_s28  ;;  %s61_s30 = int_to_ptr.vmem [resolvable:$true] %s60_s30 }
   0x5   :  { %s910_s9 = scalar_lea.vmem %s35_s28, 128  ;;  %p915_p1 = scmp.lt.s32.totalorder %s35_s28, %s35_s28 }
   0x6   :  { %p911_p0 = scmp.ne.s32.totalorder %s35_s28, %s910_s9  ;;  %p916_p2 = scmp.lt.s32.totalorder %s910_s9, %s910_s9 }
   0x8   :  { %p917_p3 = por %p916_p2, %p915_p1 }
   0xa   :  { %p918_p4 = pnand %p917_p3, %p911_p0 }
   0xc   :  { %921 = shalt.err (!%p918_p4)
}
   0xd   :  { %s1032_s10 = smov 64   ;;  %s1033_s11 = smov 4  }
   0xe   :  { %40 = dma.hbm_to_vmem [thread:$0]  %s1178_s1, 128, %s35_s28, [#allocation6], %s1032_s10, %s1032_s10, %s1033_s11  }
   0xf   :  { %s930_s14 = scalar_lea.vmem %s61_s30, 1024  ;;  %p935_p6 = scmp.lt.s32.totalorder %s61_s30, %s61_s30 }
  0x10   :  { %p931_p5 = scmp.ne.s32.totalorder %s61_s30, %s930_s14  ;;  %p936_p7 = scmp.lt.s32.totalorder %s930_s14, %s930_s14 }
  0x12   :  { %p937_p8 = por %p936_p7, %p935_p6 }
  0x14   :  { %p938_p9 = pnand %p937_p8, %p931_p5 }
  0x16   :  { %941 = shalt.err (!%p938_p9)
}
  0x17   :  { %66 = dma.hbm_to_vmem [thread:$0]  %s1181_s4, 1024, %s61_s30, [#allocation9], %s1032_s10, %s1032_s10, %s1033_s11  }
  0x18   :  { %s1034_s17 = smov [#allocation2]   ;;  %s1035_s19 = smov [#allocation7]  }
  0x19   :  { %s22_s18 = sshll.u32 %s1034_s17, 4  ;;  %s46_s20 = sshll.u32 %s1035_s19, 4  ;;  %s23_s18 = int_to_ptr.vmem [resolvable:$true] %s22_s18  ;;  %s47_s20 = int_to_ptr.vmem [resolvable:$true] %s46_s20 }
  0x1a   :  { %s950_s1 = scalar_lea.vmem %s23_s18, 128  ;;  %p955_p11 = scmp.lt.s32.totalorder %s23_s18, %s23_s18 }
  0x1b   :  { %p951_p10 = scmp.ne.s32.totalorder %s23_s18, %s950_s1  ;;  %p956_p12 = scmp.lt.s32.totalorder %s950_s1, %s950_s1 }
  0x1d   :  { %p957_p13 = por %p956_p12, %p955_p11 }
  0x1f   :  { %p958_p0 = pnand %p957_p13, %p951_p10 }
  0x21   :  { %961 = shalt.err (!%p958_p0)
}
  0x22   :  { %28 = dma.hbm_to_vmem [thread:$0]  %s1177_s0, 128, %s23_s18, [#allocation3], %s1032_s10, %s1032_s10, %s1033_s11  }
  0x23   :  { %s970_s4 = scalar_lea.vmem %s47_s20, 1024  ;;  %p975_p2 = scmp.lt.s32.totalorder %s47_s20, %s47_s20 }
  0x24   :  { %p971_p1 = scmp.ne.s32.totalorder %s47_s20, %s970_s4  ;;  %p976_p3 = scmp.lt.s32.totalorder %s970_s4, %s970_s4 }
  0x26   :  { %p977_p4 = por %p976_p3, %p975_p2 }
  0x28   :  { %p978_p5 = pnand %p977_p4, %p971_p1 }
  0x2a   :  { %981 = shalt.err (!%p978_p5)
}
  0x2b   :  { %52 = dma.hbm_to_vmem [thread:$0]  %s1179_s2, 1024, %s47_s20, [#allocation6], %s1032_s10, %s1032_s10, %s1033_s11  }
  0x2c   :  { %s1036_s25 = smov [#allocation10]  }
  0x2d   :  { %s74_s26 = sshll.u32 %s1036_s25, 4  ;;  %s75_s26 = int_to_ptr.vmem [resolvable:$true] %s74_s26 }
  0x2e   :  { %s990_s27 = scalar_lea.vmem %s75_s26, 1024  ;;  %p995_p7 = scmp.lt.s32.totalorder %s75_s26, %s75_s26 }
  0x2f   :  { %p991_p6 = scmp.ne.s32.totalorder %s75_s26, %s990_s27  ;;  %p996_p8 = scmp.lt.s32.totalorder %s990_s27, %s990_s27 }
  0x31   :  { %p997_p9 = por %p996_p8, %p995_p7 }
  0x33   :  { %p998_p10 = pnand %p997_p9, %p991_p6 }
  0x35   :  { %1001 = shalt.err (!%p998_p10)
}
  0x36   :  { %80 = dma.hbm_to_vmem [thread:$0]  %s1183_s6, 1024, %s75_s26, [#allocation9], %s1032_s10, %s1032_s10, %s1033_s11  }
  0x37   :  { %1022 = dma.done.wait [#allocation3], 128  }
  0x38   :  { %1023 = vsyncadd [#allocation3], 4294967168 }
  0x39   :  { %1024 = dma.done.wait [#allocation6], 1152  }
  0x3a   :  { %1025 = vsyncadd [#allocation6], 4294966144 }
  0x3b   :  { %1026 = dma.done.wait [#allocation9], 2048  }
  0x3c   :  { %1027 = vsyncadd [#allocation9], 4294965248  ;;  %v1037_v0 = vmov 0.0   ;;  %vm1038_vm0 = vmmov 0   ;;  %v868_v1 = vld [vmem:[#allocation7 + $0x38] sm:$0xff]   ;;  %v870_v3 = vld [vmem:[#allocation7 + $0x30] sm:$0xff]  }
  0x3d   :  { %772 = vmatprep.subr.bf16.mxu0 %v1037_v0  ;;  %792 = vmatprep.subr.bf16.mxu1 %v1037_v0  ;;  %v869_v2 = vld [vmem:[#allocation8 + $0x38] sm:$0xff]   ;;  %v871_v4 = vld [vmem:[#allocation8 + $0x30] sm:$0xff]   ;;  %v872_v5 = vld [vmem:[#allocation7 + $0x28] sm:$0xff]   ;;  %vm555_vm1 = vcmask 64512   ;;  %vm583_vm2 = vcmask 1043456  }
  0x3e   :  { %788 = vmatprep.mubr.msk.bf16.mxu0 %vm1038_vm0, %v1037_v0  ;;  %808 = vmatprep.mubr.msk.bf16.mxu1 %vm1038_vm0, %v1037_v0  ;;  %v873_v6 = vld [vmem:[#allocation8 + $0x28] sm:$0xff]   ;;  %v874_v7 = vld [vmem:[#allocation7 + $0x20] sm:$0xff]   ;;  %v876_v9 = vld [vmem:[#allocation7 + $0x18] sm:$0xff]  }
  0x3f   :  { %773 = vmatpush3.bf16.msra.mxu0 %v868_v1  ;;  %793 = vmatpush3.bf16.msra.mxu1 %v869_v2  ;;  %v875_v8 = vld [vmem:[#allocation8 + $0x20] sm:$0xff]   ;;  %v877_v10 = vld [vmem:[#allocation8 + $0x18] sm:$0xff]   ;;  %v878_v11 = vld [vmem:[#allocation7 + $0x10] sm:$0xff]  }
  0x40   :  { %774 = vmatprep.subr.bf16.mxu0 %v1037_v0  ;;  %794 = vmatprep.subr.bf16.mxu1 %v1037_v0  ;;  %v879_v12 = vld [vmem:[#allocation8 + $0x10] sm:$0xff]   ;;  %v880_v13 = vld [vmem:[#allocation7 + $0x8] sm:$0xff]   ;;  %v882_v15 = vld [vmem:[#allocation7] sm:$0xff]  }
  0x41   :  { %v881_v14 = vld [vmem:[#allocation8 + $0x8] sm:$0xff]   ;;  %v883_v16 = vld [vmem:[#allocation8] sm:$0xff]   ;;  %v884_v17 = vld [vmem:[#allocation2] sm:$0xff]  }
  0x42   :  { %v885_v18 = vld [vmem:[#allocation5] sm:$0xff]   ;;  %v694_v19 = vld [vmem:[%s1180_s3] ss:$0 sm:$0xff]  ;;  %v888_v41 = vld [vmem:[#allocation10 + $0x28] sm:$0xff]  }
  0x43   :  { %775 = vmatpush3.bf16.msra.mxu0 %v870_v3  ;;  %795 = vmatpush3.bf16.msra.mxu1 %v871_v4  ;;  %v704_v20 = vld [vmem:[%s1182_s5] ss:$0 sm:$0xff]  ;;  %v886_v39 = vld [vmem:[#allocation10 + $0x38] sm:$0xff]   ;;  %v889_v42 = vld [vmem:[#allocation10 + $0x20] sm:$0xff]  }
  0x44   :  { %776 = vmatprep.subr.bf16.mxu0 %v1037_v0  ;;  %796 = vmatprep.subr.bf16.mxu1 %v1037_v0  ;;  %v887_v40 = vld [vmem:[#allocation10 + $0x30] sm:$0xff]   ;;  %v890_v43 = vld [vmem:[#allocation10 + $0x18] sm:$0xff]   ;;  %v892_v45 = vld [vmem:[#allocation10 + $0x8] sm:$0xff]  }
  0x45   :  { %v891_v44 = vld [vmem:[#allocation10 + $0x10] sm:$0xff]   ;;  %v893_v46 = vld [vmem:[#allocation10] sm:$0xff]  }
  0x46   :  { %v714_v4 = vld [vmem:[%s1184_s7] ss:$0 sm:$0xff]  ;;  %s1039_s7 = smov [#allocation11]  }
  0x47   :  { %777 = vmatpush3.bf16.msra.mxu0 %v872_v5  ;;  %797 = vmatpush3.bf16.msra.mxu1 %v873_v6  ;;  %s680_s9 = sshll.u32 %s1039_s7, 4  ;;  %s681_s9 = int_to_ptr.vmem [resolvable:$true] %s680_s9 }
  0x48   :  { %778 = vmatprep.subr.bf16.mxu0 %v1037_v0  ;;  %798 = vmatprep.subr.bf16.mxu1 %v1037_v0  ;;  %s1002_s10 = scalar_lea.vmem %s681_s9, 256  ;;  %p1007_p12 = scmp.lt.s32.totalorder %s681_s9, %s681_s9 }
  0x49   :  { %p1003_p11 = scmp.ne.s32.totalorder %s681_s9, %s1002_s10  ;;  %p1008_p13 = scmp.lt.s32.totalorder %s1002_s10, %s1002_s10 }
  0x4b   :  { %779 = vmatpush3.bf16.msra.mxu0 %v874_v7  ;;  %799 = vmatpush3.bf16.msra.mxu1 %v875_v8  ;;  %p1009_p0 = por %p1008_p13, %p1007_p12 }
  0x4c   :  { %780 = vmatprep.subr.bf16.mxu0 %v1037_v0  ;;  %800 = vmatprep.subr.bf16.mxu1 %v1037_v0 }
  0x4d   :  { %p1010_p1 = pnand %p1009_p0, %p1003_p11 }
  0x4f   :  { %781 = vmatpush3.bf16.msra.mxu0 %v876_v9  ;;  %801 = vmatpush3.bf16.msra.mxu1 %v877_v10 }
  0x50   :  { %782 = vmatprep.subr.bf16.mxu0 %v1037_v0  ;;  %802 = vmatprep.subr.bf16.mxu1 %v1037_v0 }
  0x53   :  { %783 = vmatpush3.bf16.msra.mxu0 %v878_v11  ;;  %803 = vmatpush3.bf16.msra.mxu1 %v879_v12 }
  0x54   :  { %784 = vmatprep.subr.bf16.mxu0 %v1037_v0  ;;  %804 = vmatprep.subr.bf16.mxu1 %v1037_v0 }
  0x57   :  { %785 = vmatpush3.bf16.msra.mxu0 %v880_v13  ;;  %805 = vmatpush3.bf16.msra.mxu1 %v881_v14 }
  0x58   :  { %786 = vmatprep.subr.bf16.mxu0 %v1037_v0  ;;  %806 = vmatprep.subr.bf16.mxu1 %v1037_v0 }
  0x5b   :  { %787 = vmatpush3.bf16.msra.mxu0 %v882_v15  ;;  %807 = vmatpush3.bf16.msra.mxu1 %v883_v16 }
  0x5c   :  { %812 = vmatprep.subr.bf16.mxu0 %v1037_v0  ;;  %832 = vmatprep.subr.bf16.mxu1 %v1037_v0 }
  0x5e   :  { %789 = vmatmul.mubr.bf16.vlgmr.msra.gmra.mxu0 %v884_v17  ;;  %809 = vmatmul.mubr.bf16.vlgmr.msra.gmra.mxu1 %v885_v18 }
  0x5f   :  { %828 = vmatprep.mubr.msk.bf16.mxu0 %vm1038_vm0, %v1037_v0  ;;  %834 = vmatprep.mubr.msk.bf16.mxu1 %vm1038_vm0, %v1037_v0 }
  0x60   :  { %813 = vmatpush3.bf16.msra.mxu0 %v886_v39 }
  0x61   :  { %814 = vmatprep.subr.bf16.mxu0 %v1037_v0 }
  0x64   :  { %815 = vmatpush3.bf16.msra.mxu0 %v887_v40 }
  0x65   :  { %816 = vmatprep.subr.bf16.mxu0 %v1037_v0 }
  0x68   :  { %817 = vmatpush3.bf16.msra.mxu0 %v888_v41 }
  0x69   :  { %818 = vmatprep.subr.bf16.mxu0 %v1037_v0 }
  0x6c   :  { %819 = vmatpush3.bf16.msra.mxu0 %v889_v42 }
  0x6d   :  { %820 = vmatprep.subr.bf16.mxu0 %v1037_v0 }
  0x70   :  { %821 = vmatpush3.bf16.msra.mxu0 %v890_v43 }
  0x71   :  { %822 = vmatprep.subr.bf16.mxu0 %v1037_v0 }
  0x74   :  { %823 = vmatpush3.bf16.msra.mxu0 %v891_v44 }
  0x75   :  { %824 = vmatprep.subr.bf16.mxu0 %v1037_v0 }
  0x78   :  { %825 = vmatpush3.bf16.msra.mxu0 %v892_v45 }
  0x79   :  { %826 = vmatprep.subr.bf16.mxu0 %v1037_v0 }
  0x7c   :  { %827 = vmatpush3.bf16.msra.mxu0 %v893_v46 }
  0x7f   :  { %829 = vmatmul.mubr.bf16.vlgmr.msra.gmra.mxu0 %v885_v18 }
 0x11e   :  { %v214_v21 = vpop.f32.mrf.mxu0  ;;  %v332_v23 = vpop.f32.mrf.mxu1 }
 0x11f   :  { %v215_v22 = vadd.f32 %v694_v19, %v214_v21  ;;  %v333_v24 = vadd.f32 %v704_v20, %v332_v23 }
 0x120   :  { %v790_v25 = vpop.f32.mrf.mxu0  ;;  %v810_v26 = vpop.f32.mrf.mxu1 }
 0x121   :  { %v733_v27 = vpack.c.bf16 %v333_v24, %v333_v24  ;;  %v451_v29 = vmul.f32 0.088388346, %v215_v22 }
 0x122   :  { %v217_v28 = vpop.f32.mrf.mxu0  ;;  %v335_v30 = vpop.f32.mrf.mxu1 }
 0x123   :  { %833 = vmatpush3.bf16.xpose.msra.mxu1 %v733_v27  ;;  %v336_v33 = vadd.f32 %v704_v20, %v335_v30  ;;  %v731_v34 = vpack.c.bf16 %v451_v29, %v451_v29  ;;  %v218_v35 = vadd.f32 %v694_v19, %v217_v28 }
 0x124   :  { %v791_v31 = vpop.f32.mrf.mxu0  ;;  %v811_v32 = vpop.f32.mrf.mxu1  ;;  %838 = vmatprep.subr.bf16.mxu1 %v1037_v0 }
 0x125   :  { %v734_v36 = vpack.c.bf16 %v336_v33, %v336_v33  ;;  %v452_v37 = vmul.f32 0.088388346, %v218_v35 }
 0x127   :  { %v732_v38 = vpack.c.bf16 %v452_v37, %v452_v37 }
 0x12a   :  { %835 = vmatmul.mubr.bf16.vlgmr.msra.gmra.mxu1 %v731_v34 }
 0x12b   :  { %839 = vmatpush3.bf16.xpose.msra.mxu1 %v734_v36  ;;  %840 = vmatprep.mubr.msk.bf16.mxu1 %vm1038_vm0, %v1037_v0 }
 0x12c   :  { %844 = vmatprep.subr.bf16.mxu1 %v1037_v0 }
 0x132   :  { %841 = vmatmul.mubr.bf16.vlgmr.msra.gmra.mxu1 %v732_v38 }
 0x133   :  { %846 = vmatprep.mubr.msk.bf16.mxu1 %vm1038_vm0, %v1037_v0 }
 0x13f   :  { %v444_v5 = vpop.f32.mrf.mxu0 }
 0x140   :  { %v445_v6 = vadd.f32 %v714_v4, %v444_v5 }
 0x141   :  { %v830_v7 = vpop.f32.mrf.mxu0 }
 0x142   :  { %v735_v8 = vpack.c.bf16 %v445_v6, %v445_v6 }
 0x143   :  { %v447_v9 = vpop.f32.mrf.mxu0 }
 0x144   :  { %v585_v10 = vsel %vm583_vm2, %v735_v8, 0  ;;  %v448_v11 = vadd.f32 %v714_v4, %v447_v9 }
 0x145   :  { %v831_v12 = vpop.f32.mrf.mxu0  ;;  %845 = vmatpush3.bf16.msra.mxu1 %v585_v10 }
 0x146   :  { %v736_v13 = vpack.c.bf16 %v448_v11, %v448_v11  ;;  %850 = vmatprep.subr.bf16.mxu1 %v1037_v0 }
 0x148   :  { %v631_v14 = vsel %vm583_vm2, %v736_v13, 0 }
 0x1ea   :  { %v509_v47 = vpop.f32.mrf.mxu1 }
 0x1eb   :  { %v556_v48 = vsel %vm555_vm1, %v509_v47, -inf }
 0x1ec   :  { %557 = vmax.xlane.f32.xlu0 %v556_v48  ;;  %v836_v49 = vpop.f32.mrf.mxu1 }
 0x1ee   :  { %v512_v50 = vpop.f32.mrf.mxu1 }
 0x1f0   :  { %v837_v51 = vpop.f32.mrf.mxu1 }
 0x1f2   :  { %v549_v52 = vpop.f32.mrf.mxu1 }
 0x1f3   :  { %v559_v53 = vsel %vm555_vm1, %v549_v52, -inf }
 0x1f4   :  { %560 = vmax.xlane.f32.xlu0 %v559_v53  ;;  %v842_v54 = vpop.f32.mrf.mxu1 }
 0x1f6   :  { %v552_v55 = vpop.f32.mrf.mxu1 }
 0x1f8   :  { %v843_v56 = vpop.f32.mrf.mxu1 }
 0x275   :  { %v558_v57 = vpop.xlane.xlu0 %557 }
 0x276   :  { %v562_v58 = vsub.f32 %v509_v47, %v558_v57 }
 0x278   :  { %v564_v59 = vmul.f32 1.442695, %v562_v58 }
 0x27a   :  { %894 = vpow2.f32 %v564_v59 }
 0x27d   :  { %v561_v60 = vpop.xlane.xlu0 %560 }
 0x27e   :  { %v563_v61 = vsub.f32 %v549_v52, %v561_v60 }
 0x280   :  { %v566_v62 = vmul.f32 1.442695, %v563_v61 }
 0x282   :  { %896 = vpow2.f32 %v566_v62 }
 0x287   :  { %v895_v63 = vpop.eup %894 }
 0x288   :  { %v568_v1 = vsel %vm555_vm1, %v895_v63, 0.0 }
 0x289   :  { %569 = vadd.xlane.f32.xlu1 %v568_v1 }
 0x28f   :  { %v897_v2 = vpop.eup %896 }
 0x290   :  { %v571_v3 = vsel %vm555_vm1, %v897_v2, 0.0 }
 0x291   :  { %572 = vadd.xlane.f32.xlu1 %v571_v3 }
 0x312   :  { %v570_v15 = vpop.xlane.xlu1 %569 }
 0x313   :  { %898 = vrcp.f32 %v570_v15 }
 0x31a   :  { %v573_v16 = vpop.xlane.xlu1 %572 }
 0x31b   :  { %900 = vrcp.f32 %v573_v16 }
 0x320   :  { %v899_v17 = vpop.eup %898 }
 0x321   :  { %v576_v18 = vmul.f32 %v899_v17, %v895_v63 }
 0x323   :  { %v578_v19 = vpack.c.bf16 %v576_v18, %v576_v18 }
 0x325   :  { %847 = vmatmul.mubr.msk.bf16.vlgmr.msra.gmra.mxu1 %vm555_vm1, %v578_v19 }
 0x326   :  { %851 = vmatpush3.bf16.msra.mxu1 %v631_v14  ;;  %852 = vmatprep.mubr.msk.bf16.mxu1 %vm1038_vm0, %v1037_v0 }
 0x328   :  { %v901_v20 = vpop.eup %900 }
 0x329   :  { %v577_v21 = vmul.f32 %v901_v20, %v897_v2 }
 0x32b   :  { %v579_v22 = vpack.c.bf16 %v577_v21, %v577_v21 }
 0x32d   :  { %853 = vmatmul.mubr.msk.bf16.vlgmr.msra.gmra.mxu1 %vm555_vm1, %v579_v22 }
 0x3e5   :  { %v621_v23 = vpop.f32.mrf.mxu1 }
 0x3e6   :  { %673 = vst [vmem:[#allocation11] sm:$0xff] %v621_v23 }
 0x3e7   :  { %v848_v24 = vpop.f32.mrf.mxu1 }
 0x3e9   :  { %v624_v25 = vpop.f32.mrf.mxu1 }
 0x3eb   :  { %v849_v26 = vpop.f32.mrf.mxu1 }
 0x3ed   :  { %v667_v27 = vpop.f32.mrf.mxu1 }
 0x3ee   :  { %674 = vst [vmem:[#allocation11 + $0x8] sm:$0xff] %v667_v27 }
 0x3ef   :  { %v854_v28 = vpop.f32.mrf.mxu1 }
 0x3f0   :  { %1013 = shalt.err (!%p1010_p1)
}
 0x3f1   :  { %s1040_s11 = smov 128   ;;  %s1041_s12 = smov 8   ;;  %v670_v0 = vpop.f32.mrf.mxu1 }
 0x3f2   :  { %686 = dma.vmem_to_hbm [thread:$0]  %s681_s9, 256, %s1185_s8, [#allocation4], %s1040_s11, %s1040_s11, %s1041_s12  }
 0x3f3   :  { %v855_v29 = vpop.f32.mrf.mxu1 }
 0x3f4   :  { %1028 = dma.done.wait [#allocation4], 256  }
 0x3f5   :  { %1029 = vsyncadd [#allocation4], 4294967040 }
 0x3f6   :  { %690 = vsyncpa [#allocation3], 1 }
 0x3f7   :  { %691 = vsyncpa [#allocation6], 1 }
 0x3f8   :  { %692 = vsyncpa [#allocation9], 1 }
 0x3f9   :  { %693 = vsyncpa [#allocation4], 1 }

</bundles_post_ra>
